<compile_context>
chip_gen: v7x
topology: tpu7x:2x2x1
jax: 0.10.0
libtpu: 0.0.40
codegen_flags: <defaults>
</compile_context>

<pallas_src>
import jax
import jax.numpy as jnp
from jax.experimental import pallas as pl
from jax.experimental.pallas import tpu as pltpu

IN_SIZE = 28 * 28          # 784
HIDDEN = [256, 128, 64]
OUT_SIZE = 10
OUT_PAD = 128              # lane-dense padded output width


def _round_up(x, m):
    return ((x + m - 1) // m) * m


def fc_net_kernel(x_ref,
                  w1_ref, b1_ref,
                  w2_ref, b2_ref,
                  w3_ref, b3_ref,
                  w4_ref, b4_ref,
                  o_ref):
    """Fused 4-layer MLP forward on one batch tile.

    x arrives as f32 and is cast to bf16 in-kernel (cheap VPU work hidden
    under the matmuls).  Matmuls use bf16 operands with f32 accumulation on
    the MXU; bias add + ReLU run in f32 on the VPU; activations are re-cast to
    bf16 before the next matmul; the padded output is stored as bf16.
    """
    x = x_ref[...].astype(jnp.bfloat16)   # (TB, 784) bf16

    h1 = jnp.dot(x, w1_ref[...], preferred_element_type=jnp.float32) + b1_ref[...]
    h1 = jnp.maximum(h1, 0.0).astype(jnp.bfloat16)

    h2 = jnp.dot(h1, w2_ref[...], preferred_element_type=jnp.float32) + b2_ref[...]
    h2 = jnp.maximum(h2, 0.0).astype(jnp.bfloat16)

    h3 = jnp.dot(h2, w3_ref[...], preferred_element_type=jnp.float32) + b3_ref[...]
    h3 = jnp.maximum(h3, 0.0).astype(jnp.bfloat16)

    out = jnp.dot(h3, w4_ref[...], preferred_element_type=jnp.float32) + b4_ref[...]
    o_ref[...] = out.astype(o_ref.dtype)  # (TB, 128) bf16, lane-dense store


def prepare_params(params):
    """One-time conversion of f32 (W, b) pairs into kernel-ready operands.

    bf16 weights; last layer padded to a full 128-lane output slab (zeros
    beyond 10); biases stay f32. Hoisted out of the per-call path so the
    forward launches only the pallas_call (plus the final slice/cast).
    """
    (w1, b1), (w2, b2), (w3, b3), (w4, b4) = params
    w4p = jnp.zeros((HIDDEN[2], OUT_PAD), jnp.float32).at[:, :OUT_SIZE].set(w4)
    b4p = jnp.zeros((1, OUT_PAD), jnp.float32).at[:, :OUT_SIZE].set(b4)
    return (w1.astype(jnp.bfloat16), b1,
            w2.astype(jnp.bfloat16), b2,
            w3.astype(jnp.bfloat16), b3,
            w4p.astype(jnp.bfloat16), b4p)


def _choose_tb(B, tb_max):
    """Batch tile: multiple of 16, capped by tb_max, >= 4 grid steps for large
    batches (so v7x's 2 TensorCores each get >= 2 pipelined steps), and never
    larger than the 8-rounded batch (avoids oversized tiles at tiny B)."""
    tb = _round_up(-(-B // 4), 16)        # cdiv(B, 4) rounded up to 16
    tb = min(tb, tb_max)
    tb = min(tb, _round_up(B, 8))
    return max(tb, 8)


def fc_net_forward(x, prepared_params, *, tb_max=1024):
    """x: (B, 784) float32. prepared_params: output of prepare_params().

    Returns (B, 10) float32 logits, matching the PyTorch forward.
    tb_max: 1024 is safe everywhere (incl. v5e); sweep 2048 on v6e/v7x.
    """
    B = x.shape[0]
    w1b, b1, w2b, b2, w3b, b3, w4b, b4p = prepared_params

    TB = _choose_tb(B, tb_max)
    grid = (pl.cdiv(B, TB),)   # partial last block; no jnp.pad copy of x

    # Streamed operands: x tile / out tile move with the grid index.
    x_spec = pl.BlockSpec((TB, IN_SIZE), lambda i: (i, 0))
    o_spec = pl.BlockSpec((TB, OUT_PAD), lambda i: (i, 0))
    # VMEM-resident operands: whole array, constant block index (fetched once).
    w1_spec = pl.BlockSpec((IN_SIZE, HIDDEN[0]), lambda i: (0, 0))
    b1_spec = pl.BlockSpec((1, HIDDEN[0]), lambda i: (0, 0))
    w2_spec = pl.BlockSpec((HIDDEN[0], HIDDEN[1]), lambda i: (0, 0))
    b2_spec = pl.BlockSpec((1, HIDDEN[1]), lambda i: (0, 0))
    w3_spec = pl.BlockSpec((HIDDEN[1], HIDDEN[2]), lambda i: (0, 0))
    b3_spec = pl.BlockSpec((1, HIDDEN[2]), lambda i: (0, 0))
    w4_spec = pl.BlockSpec((HIDDEN[2], OUT_PAD), lambda i: (0, 0))
    b4_spec = pl.BlockSpec((1, OUT_PAD), lambda i: (0, 0))

    # Advisory cost estimate for the XLA scheduler.
    flops = 2 * B * (IN_SIZE * HIDDEN[0]
                     + HIDDEN[0] * HIDDEN[1]
                     + HIDDEN[1] * HIDDEN[2]
                     + HIDDEN[2] * OUT_PAD)
    weight_bytes = (w1b.size + w2b.size + w3b.size + w4b.size) * 2 \
                   + (b1.size + b2.size + b3.size + b4p.size) * 4
    bytes_accessed = x.size * 4 + weight_bytes + B * OUT_PAD * 2
    cost = pl.CostEstimate(flops=flops, transcendentals=0,
                           bytes_accessed=bytes_accessed)

    out_padded = pl.pallas_call(
        fc_net_kernel,
        out_shape=jax.ShapeDtypeStruct((B, OUT_PAD), jnp.bfloat16),
        grid=grid,
        in_specs=[x_spec,
                  w1_spec, b1_spec,
                  w2_spec, b2_spec,
                  w3_spec, b3_spec,
                  w4_spec, b4_spec],
        out_specs=o_spec,
        compiler_params=pltpu.CompilerParams(
            dimension_semantics=("parallel",),
            # Double-buffered f32 x + bf16 out tiles, resident weights, f32
            # intermediates: ~20 MiB at TB=2048. 48 MiB leaves ample headroom
            # and stays well under physical VMEM on v5e/v6e (128 MiB) and
            # v7x (64 MiB).
            vmem_limit_bytes=48 * 1024 * 1024),
        cost_estimate=cost,
    )(x, w1b, b1, w2b, b2, w3b, b3, w4b, b4p)

    # Out-of-bounds rows of a partial last block are discarded by Pallas; only
    # the 10 real logit lanes are kept.
    return out_padded[:, :OUT_SIZE].astype(jnp.float32)


def init_params(key):
    """Deterministic init mimicking torch.nn.Linear default (U[-1/sqrt(in), 1/sqrt(in)])."""
    sizes = [IN_SIZE] + HIDDEN + [OUT_SIZE]
    params = []
    for fan_in, fan_out in zip(sizes[:-1], sizes[1:]):
        key, kw, kb = jax.random.split(key, 3)
        bound = 1.0 / (fan_in ** 0.5)
        w = jax.random.uniform(kw, (fan_in, fan_out), jnp.float32, -bound, bound)
        b = jax.random.uniform(kb, (1, fan_out), jnp.float32, -bound, bound)
        params.append((w, b))
    return params


def reference_forward(x, params):
    """Pure-JAX f32 reference matching the PyTorch module."""
    h = x
    for i, (w, b) in enumerate(params):
        h = h @ w + b
        if i < len(params) - 1:
            h = jnp.maximum(h, 0.0)
    return h


if __name__ == "__main__":
    key = jax.random.PRNGKey(0)
    key, kx = jax.random.split(key)

    B = 8  # small demo batch (production callers should batch >= 256 rows)
    x = jax.random.normal(kx, (B, IN_SIZE), jnp.float32)  # flattened 28x28 images
    params = init_params(key)
    prepared = prepare_params(params)   # one-time: bf16 weights + padded last layer

    out = fc_net_forward(x, prepared)
    out = jax.block_until_ready(out)

    ref = reference_forward(x, params)
    assert out.shape == (B, OUT_SIZE)
    # bf16 matmul operands + bf16 output store with f32 accumulation
    # -> ~1e-2-level deviation vs the pure-f32 reference.
    assert jnp.allclose(out, ref, atol=5e-2, rtol=5e-2), \
        f"max abs diff {jnp.max(jnp.abs(out - ref))}"

    print("KERNEL_OK")
</pallas_src>

<mosaic_0001>
module attributes {stable_mosaic.version = 11 : i64} {
  func.func @fc_net_kernel(%arg0: i32, %arg1: memref<8x784xf32, #tpu.memory_space<vmem>>, %arg2: memref<784x256xbf16, #tpu.memory_space<vmem>>, %arg3: memref<1x256xf32, #tpu.memory_space<vmem>>, %arg4: memref<256x128xbf16, #tpu.memory_space<vmem>>, %arg5: memref<1x128xf32, #tpu.memory_space<vmem>>, %arg6: memref<128x64xbf16, #tpu.memory_space<vmem>>, %arg7: memref<1x64xf32, #tpu.memory_space<vmem>>, %arg8: memref<64x128xbf16, #tpu.memory_space<vmem>>, %arg9: memref<1x128xf32, #tpu.memory_space<vmem>>, %arg10: memref<8x128xbf16, #tpu.memory_space<vmem>>) attributes {dimension_semantics = [#tpu.dimension_semantics<parallel>], iteration_bounds = array<i64: 1>, scalar_prefetch = 0 : i64, scratch_operands = 0 : i64, tpu.core_type = #tpu.core_type<tc>, window_params = [{transform_indices = @transform_0, window_bounds = array<i64: 8, 784>}, {pipeline_mode = #tpu.pipeline_mode<synchronous>, transform_indices = @transform_1, window_bounds = array<i64: 784, 256>}, {pipeline_mode = #tpu.pipeline_mode<synchronous>, transform_indices = @transform_2, window_bounds = array<i64: 1, 256>}, {pipeline_mode = #tpu.pipeline_mode<synchronous>, transform_indices = @transform_3, window_bounds = array<i64: 256, 128>}, {pipeline_mode = #tpu.pipeline_mode<synchronous>, transform_indices = @transform_4, window_bounds = array<i64: 1, 128>}, {pipeline_mode = #tpu.pipeline_mode<synchronous>, transform_indices = @transform_5, window_bounds = array<i64: 128, 64>}, {pipeline_mode = #tpu.pipeline_mode<synchronous>, transform_indices = @transform_6, window_bounds = array<i64: 1, 64>}, {pipeline_mode = #tpu.pipeline_mode<synchronous>, transform_indices = @transform_7, window_bounds = array<i64: 64, 128>}, {pipeline_mode = #tpu.pipeline_mode<synchronous>, transform_indices = @transform_8, window_bounds = array<i64: 1, 128>}, {transform_indices = @transform_9, window_bounds = array<i64: 8, 128>}]} {
    %c0 = arith.constant 0 : index
    %c0_0 = arith.constant 0 : index
    %0 = vector.load %arg1[%c0, %c0_0] : memref<8x784xf32, #tpu.memory_space<vmem>>, vector<8x784xf32>
    %1 = arith.truncf %0 : vector<8x784xf32> to vector<8x784xbf16>
    %c0_1 = arith.constant 0 : index
    %c0_2 = arith.constant 0 : index
    %2 = vector.load %arg2[%c0_1, %c0_2] : memref<784x256xbf16, #tpu.memory_space<vmem>>, vector<784x256xbf16>
    %cst = arith.constant dense<0.000000e+00> : vector<8x256xf32>
    %3 = tpu.matmul %1, %2, %cst {dimension_numbers = #tpu.dot_dimension_numbers<[1], [0], [0], [1], [0, 0, 1, 1], [], []>} : vector<8x784xbf16>, vector<784x256xbf16>, vector<8x256xf32> -> vector<8x256xf32>
    %c0_3 = arith.constant 0 : index
    %c0_4 = arith.constant 0 : index
    %4 = vector.load %arg3[%c0_3, %c0_4] : memref<1x256xf32, #tpu.memory_space<vmem>>, vector<1x256xf32>
    %5 = vector.broadcast %4 : vector<1x256xf32> to vector<8x256xf32>
    %6 = arith.addf %3, %5 : vector<8x256xf32>
    %cst_5 = arith.constant 0.000000e+00 : f32
    %7 = vector.broadcast %cst_5 : f32 to vector<8x256xf32>
    %8 = arith.maximumf %6, %7 : vector<8x256xf32>
    %9 = arith.truncf %8 : vector<8x256xf32> to vector<8x256xbf16>
    %c0_6 = arith.constant 0 : index
    %c0_7 = arith.constant 0 : index
    %10 = vector.load %arg4[%c0_6, %c0_7] : memref<256x128xbf16, #tpu.memory_space<vmem>>, vector<256x128xbf16>
    %cst_8 = arith.constant dense<0.000000e+00> : vector<8x128xf32>
    %11 = tpu.matmul %9, %10, %cst_8 {dimension_numbers = #tpu.dot_dimension_numbers<[1], [0], [0], [1], [0, 0, 1, 1], [], []>} : vector<8x256xbf16>, vector<256x128xbf16>, vector<8x128xf32> -> vector<8x128xf32>
    %c0_9 = arith.constant 0 : index
    %c0_10 = arith.constant 0 : index
    %12 = vector.load %arg5[%c0_9, %c0_10] : memref<1x128xf32, #tpu.memory_space<vmem>>, vector<1x128xf32>
    %13 = vector.broadcast %12 : vector<1x128xf32> to vector<8x128xf32>
    %14 = arith.addf %11, %13 : vector<8x128xf32>
    %cst_11 = arith.constant 0.000000e+00 : f32
    %15 = vector.broadcast %cst_11 : f32 to vector<8x128xf32>
    %16 = arith.maximumf %14, %15 : vector<8x128xf32>
    %17 = arith.truncf %16 : vector<8x128xf32> to vector<8x128xbf16>
    %c0_12 = arith.constant 0 : index
    %c0_13 = arith.constant 0 : index
    %18 = vector.load %arg6[%c0_12, %c0_13] : memref<128x64xbf16, #tpu.memory_space<vmem>>, vector<128x64xbf16>
    %cst_14 = arith.constant dense<0.000000e+00> : vector<8x64xf32>
    %19 = tpu.matmul %17, %18, %cst_14 {dimension_numbers = #tpu.dot_dimension_numbers<[1], [0], [0], [1], [0, 0, 1, 1], [], []>} : vector<8x128xbf16>, vector<128x64xbf16>, vector<8x64xf32> -> vector<8x64xf32>
    %c0_15 = arith.constant 0 : index
    %c0_16 = arith.constant 0 : index
    %20 = vector.load %arg7[%c0_15, %c0_16] : memref<1x64xf32, #tpu.memory_space<vmem>>, vector<1x64xf32>
    %21 = vector.broadcast %20 : vector<1x64xf32> to vector<8x64xf32>
    %22 = arith.addf %19, %21 : vector<8x64xf32>
    %cst_17 = arith.constant 0.000000e+00 : f32
    %23 = vector.broadcast %cst_17 : f32 to vector<8x64xf32>
    %24 = arith.maximumf %22, %23 : vector<8x64xf32>
    %25 = arith.truncf %24 : vector<8x64xf32> to vector<8x64xbf16>
    %c0_18 = arith.constant 0 : index
    %c0_19 = arith.constant 0 : index
    %26 = vector.load %arg8[%c0_18, %c0_19] : memref<64x128xbf16, #tpu.memory_space<vmem>>, vector<64x128xbf16>
    %cst_20 = arith.constant dense<0.000000e+00> : vector<8x128xf32>
    %27 = tpu.matmul %25, %26, %cst_20 {dimension_numbers = #tpu.dot_dimension_numbers<[1], [0], [0], [1], [0, 0, 1, 1], [], []>} : vector<8x64xbf16>, vector<64x128xbf16>, vector<8x128xf32> -> vector<8x128xf32>
    %c0_21 = arith.constant 0 : index
    %c0_22 = arith.constant 0 : index
    %28 = vector.load %arg9[%c0_21, %c0_22] : memref<1x128xf32, #tpu.memory_space<vmem>>, vector<1x128xf32>
    %29 = vector.broadcast %28 : vector<1x128xf32> to vector<8x128xf32>
    %30 = arith.addf %27, %29 : vector<8x128xf32>
    %31 = arith.truncf %30 : vector<8x128xf32> to vector<8x128xbf16>
    %c0_23 = arith.constant 0 : index
    %c0_24 = arith.constant 0 : index
    %32 = vector.load %arg10[%c0_23, %c0_24] : memref<8x128xbf16, #tpu.memory_space<vmem>>, vector<8x128xbf16>
    tpu.vector_store %arg10[%c0_23, %c0_24], %31 {strides = array<i32>} : memref<8x128xbf16, #tpu.memory_space<vmem>>, vector<8x128xbf16>,
    return
  }
  func.func @transform_0(%arg0: i32) -> (i32, i32) {
    %c0_i32 = arith.constant 0 : i32
    %c0_i32_0 = arith.constant 0 : i32
    return %arg0, %c0_i32 : i32, i32
  }
  func.func @transform_1(%arg0: i32) -> (i32, i32) {
    %c0_i32 = arith.constant 0 : i32
    %c0_i32_0 = arith.constant 0 : i32
    %c0_i32_1 = arith.constant 0 : i32
    return %c0_i32, %c0_i32_0 : i32, i32
  }
  func.func @transform_2(%arg0: i32) -> (i32, i32) {
    %c0_i32 = arith.constant 0 : i32
    %c0_i32_0 = arith.constant 0 : i32
    %c0_i32_1 = arith.constant 0 : i32
    return %c0_i32, %c0_i32_0 : i32, i32
  }
  func.func @transform_3(%arg0: i32) -> (i32, i32) {
    %c0_i32 = arith.constant 0 : i32
    %c0_i32_0 = arith.constant 0 : i32
    %c0_i32_1 = arith.constant 0 : i32
    return %c0_i32, %c0_i32_0 : i32, i32
  }
  func.func @transform_4(%arg0: i32) -> (i32, i32) {
    %c0_i32 = arith.constant 0 : i32
    %c0_i32_0 = arith.constant 0 : i32
    %c0_i32_1 = arith.constant 0 : i32
    return %c0_i32, %c0_i32_0 : i32, i32
  }
  func.func @transform_5(%arg0: i32) -> (i32, i32) {
    %c0_i32 = arith.constant 0 : i32
    %c0_i32_0 = arith.constant 0 : i32
    %c0_i32_1 = arith.constant 0 : i32
    return %c0_i32, %c0_i32_0 : i32, i32
  }
  func.func @transform_6(%arg0: i32) -> (i32, i32) {
    %c0_i32 = arith.constant 0 : i32
    %c0_i32_0 = arith.constant 0 : i32
    %c0_i32_1 = arith.constant 0 : i32
    return %c0_i32, %c0_i32_0 : i32, i32
  }
  func.func @transform_7(%arg0: i32) -> (i32, i32) {
    %c0_i32 = arith.constant 0 : i32
    %c0_i32_0 = arith.constant 0 : i32
    %c0_i32_1 = arith.constant 0 : i32
    return %c0_i32, %c0_i32_0 : i32, i32
  }
  func.func @transform_8(%arg0: i32) -> (i32, i32) {
    %c0_i32 = arith.constant 0 : i32
    %c0_i32_0 = arith.constant 0 : i32
    %c0_i32_1 = arith.constant 0 : i32
    return %c0_i32, %c0_i32_0 : i32, i32
  }
  func.func @transform_9(%arg0: i32) -> (i32, i32) {
    %c0_i32 = arith.constant 0 : i32
    %c0_i32_0 = arith.constant 0 : i32
    return %arg0, %c0_i32 : i32, i32
  }
}

</mosaic_0001>

<bundles_post_ra>
// kernel: tpu_custom_call.1
= control target key start
LH: loop header
LB: loop body
LE: loop exit
PB: predicated region body
PF: predicated region fallthrough
CT: control target
= control target key end

     0   :  { %14 = vsyncpa [#allocation3], 0  ;;  %s1886_s0 = inlined_call_operand.vmem [shape: f32[8,784], index: 0, kind: input, shape index: {}]   ;;  %s1887_s1 = inlined_call_operand.hbm [shape: bf16[784,256], index: 1, kind: input, shape index: {}]   ;;  %s1888_s2 = inlined_call_operand.vmem [shape: f32[1,256], index: 2, kind: input, shape index: {}]   ;;  %s1889_s3 = inlined_call_operand.hbm [shape: bf16[256,128], index: 3, kind: input, shape index: {}]   ;;  %s1890_s4 = inlined_call_operand.vmem [shape: f32[1,128], index: 4, kind: input, shape index: {}]   ;;  %s1891_s5 = inlined_call_operand.vmem [shape: bf16[128,64], index: 5, kind: input, shape index: {}]   ;;  %s1892_s6 = inlined_call_operand.vmem [shape: f32[1,64], index: 6, kind: input, shape index: {}]   ;;  %s1893_s7 = inlined_call_operand.vmem [shape: bf16[64,128], index: 7, kind: input, shape index: {}]   ;;  %s1894_s8 = inlined_call_operand.vmem [shape: f32[1,128], index: 8, kind: input, shape index: {}]   ;;  %s1895_s9 = inlined_call_operand.hbm [shape: bf16[8,128], index: 9, kind: output, shape index: {}]  }
   0x1   :  { %15 = vsyncpa [#allocation6], 0 }
   0x2   :  { %16 = vsyncpa [#allocation4], 0  ;;  %s1707_s30 = smov [#allocation2]   ;;  %s1635_s13 = scalar_lea.hbm %s1887_s1, 12544 }
   0x3   :  { %s24_s10 = sshll.u32 %s1707_s30, 4  ;;  %p1636_p0 = scmp.ne.s32.totalorder %s1887_s1, %s1635_s13  ;;  %s25_s10 = int_to_ptr.vmem [resolvable:$true] %s24_s10 }
   0x4   :  { %p1639_p1 = scmp.lt.u32.totalorder %s1635_s13, %s1887_s1 }
   0x6   :  { %p1641_p2 = pnand %p1639_p1, %p1636_p0 }
   0x8   :  { %1644 = shalt.err (!%p1641_p2)
}
   0x9   :  { %s1645_s18 = scalar_lea.vmem %s25_s10, 12544  ;;  %p1650_p4 = scmp.lt.s32.totalorder %s25_s10, %s25_s10 }
   0xa   :  { %p1646_p3 = scmp.ne.s32.totalorder %s25_s10, %s1645_s18  ;;  %p1651_p5 = scmp.lt.s32.totalorder %s1645_s18, %s1645_s18 }
   0xc   :  { %p1652_p6 = por %p1651_p5, %p1650_p4 }
   0xe   :  { %p1653_p7 = pnand %p1652_p6, %p1646_p3 }
  0x10   :  { %1656 = shalt.err (!%p1653_p7)
}
  0x11   :  { %s1708_s19 = smov 128   ;;  %s1709_s20 = smov 8  }
  0x12   :  { %30 = dma.hbm_to_vmem [thread:$0]  %s1887_s1, 12544, %s25_s10, [#allocation3], %s1708_s19, %s1708_s19, %s1709_s20  }
  0x13   :  { %s1710_s23 = smov [#allocation5]   ;;  %s1657_s27 = scalar_lea.hbm %s1889_s3, 2048 }
  0x14   :  { %s38_s24 = sshll.u32 %s1710_s23, 4  ;;  %p1658_p8 = scmp.ne.s32.totalorder %s1889_s3, %s1657_s27  ;;  %s39_s24 = int_to_ptr.vmem [resolvable:$true] %s38_s24 }
  0x15   :  { %p1661_p9 = scmp.lt.u32.totalorder %s1657_s27, %s1889_s3 }
  0x17   :  { %p1663_p10 = pnand %p1661_p9, %p1658_p8 }
  0x19   :  { %1666 = shalt.err (!%p1663_p10)
}
  0x1a   :  { %s1667_s12 = scalar_lea.vmem %s39_s24, 2048  ;;  %p1672_p12 = scmp.lt.s32.totalorder %s39_s24, %s39_s24 }
  0x1b   :  { %p1668_p11 = scmp.ne.s32.totalorder %s39_s24, %s1667_s12  ;;  %p1673_p13 = scmp.lt.s32.totalorder %s1667_s12, %s1667_s12 }
  0x1d   :  { %p1674_p0 = por %p1673_p13, %p1672_p12 }
  0x1f   :  { %p1675_p1 = pnand %p1674_p0, %p1668_p11 }
  0x21   :  { %1678 = shalt.err (!%p1675_p1)
}
  0x22   :  { %s1711_s1 = smov 64   ;;  %s1712_s10 = smov 4  }
  0x23   :  { %44 = dma.hbm_to_vmem [thread:$0]  %s1889_s3, 2048, %s39_s24, [#allocation6], %s1711_s1, %s1711_s1, %s1712_s10  }
  0x24   :  { %1701 = dma.done.wait [#allocation3], 12544  }
  0x25   :  { %1702 = vsyncadd [#allocation3], 4294954752 }
  0x26   :  { %1703 = dma.done.wait [#allocation6], 2048  }
  0x27   :  { %1704 = vsyncadd [#allocation6], 4294965248  ;;  %v1460_v0 = vld [vmem:[#allocation2 + $0x104] ss:$8 sps:$4 sm:$0xff]   ;;  %v1462_v1 = vld [vmem:[#allocation2 + $0x100] ss:$8 sps:$4 sm:$0xff]  }
  0x28   :  { %721 = vmatprep.subr.bf16.mxu0 %v1460_v0  ;;  %v1463_v2 = vld [vmem:[#allocation2 + $0x114] ss:$8 sps:$4 sm:$0xff]   ;;  %v1465_v3 = vld [vmem:[#allocation2 + $0x110] ss:$8 sps:$4 sm:$0xff]   ;;  %v1466_v4 = vld [vmem:[#allocation2 + $0x124] ss:$8 sps:$4 sm:$0xff]  }
  0x29   :  { %722 = vmatpush1.bf16.msra.mxu0 %v1462_v1  ;;  %v1468_v5 = vld [vmem:[#allocation2 + $0x120] ss:$8 sps:$4 sm:$0xff]   ;;  %v1469_v6 = vld [vmem:[#allocation2 + $0x134] ss:$8 sps:$4 sm:$0xff]   ;;  %v1471_v7 = vld [vmem:[#allocation2 + $0x130] ss:$8 sps:$4 sm:$0xff]  }
  0x2a   :  { %723 = vmatprep.subr.bf16.mxu0 %v1463_v2  ;;  %v1472_v8 = vld [vmem:[#allocation2 + $0x144] ss:$8 sps:$4 sm:$0xff]   ;;  %v1474_v9 = vld [vmem:[#allocation2 + $0x140] ss:$8 sps:$4 sm:$0xff]   ;;  %v1475_v10 = vld [vmem:[#allocation2 + $0x154] ss:$8 sps:$4 sm:$0xff]  }
  0x2b   :  { %v1477_v11 = vld [vmem:[#allocation2 + $0x150] ss:$8 sps:$4 sm:$0xff]   ;;  %v1478_v12 = vld [vmem:[#allocation2 + $0x164] ss:$8 sps:$4 sm:$0xff]   ;;  %v1480_v15 = vld [vmem:[#allocation2 + $0x160] ss:$8 sps:$4 sm:$0xff]  }
  0x2c   :  { %v65_v13 = vld [vmem:[%s1886_s0 + $0x18] sm:$0xff]  ;;  %v1514_v17 = vld [vmem:[#allocation2 + $0x4] ss:$8 sps:$4 sm:$0xff]   ;;  %v1519_v20 = vld [vmem:[#allocation2] ss:$8 sps:$4 sm:$0xff]   ;;  %vm676_vm0 = vcmask 130048  }
  0x2d   :  { %724 = vmatpush1.bf16.msra.mxu0 %v1465_v3  ;;  %v72_v14 = vpack.c.bf16 %v65_v13, %v65_v13  ;;  %v1481_v16 = vld [vmem:[#allocation2 + $0x174] ss:$8 sps:$4 sm:$0xff]   ;;  %v1483_v18 = vld [vmem:[#allocation2 + $0x170] ss:$8 sps:$4 sm:$0xff]   ;;  %v1484_v19 = vld [vmem:[#allocation2 + $0x184] ss:$8 sps:$4 sm:$0xff]   ;;  %680 = vmatprep.subr.bf16.mxu1 %v1514_v17 }
  0x2e   :  { %725 = vmatprep.subr.bf16.mxu0 %v1466_v4  ;;  %v1520_v21 = vld [vmem:[#allocation2 + $0x14] ss:$8 sps:$4 sm:$0xff]   ;;  %681 = vmatpush1.bf16.msra.mxu1 %v1519_v20  ;;  %v1525_v22 = vld [vmem:[#allocation2 + $0x10] ss:$8 sps:$4 sm:$0xff]   ;;  %v1526_v23 = vld [vmem:[#allocation2 + $0x24] ss:$8 sps:$4 sm:$0xff]  }
  0x2f   :  { %753 = vmatprep.mubr.bf16.mxu0 %v72_v14  ;;  %682 = vmatprep.subr.bf16.mxu1 %v1520_v21  ;;  %v1486_v24 = vld [vmem:[#allocation2 + $0x180] ss:$8 sps:$4 sm:$0xff]   ;;  %v1487_v25 = vld [vmem:[#allocation2 + $0x194] ss:$8 sps:$4 sm:$0xff]   ;;  %v1489_v28 = vld [vmem:[#allocation2 + $0x190] ss:$8 sps:$4 sm:$0xff]  }
  0x30   :  { %v1531_v26 = vld [vmem:[#allocation2 + $0x20] ss:$8 sps:$4 sm:$0xff]   ;;  %v1532_v27 = vld [vmem:[#allocation2 + $0x34] ss:$8 sps:$4 sm:$0xff]   ;;  %v1490_v29 = vld [vmem:[#allocation2 + $0x1a4] ss:$8 sps:$4 sm:$0xff]  }
  0x31   :  { %726 = vmatpush1.bf16.msra.mxu0 %v1468_v5  ;;  %v1537_v30 = vld [vmem:[#allocation2 + $0x30] ss:$8 sps:$4 sm:$0xff]   ;;  %v1538_v31 = vld [vmem:[#allocation2 + $0x44] ss:$8 sps:$4 sm:$0xff]   ;;  %v1492_v32 = vld [vmem:[#allocation2 + $0x1a0] ss:$8 sps:$4 sm:$0xff]  }
  0x32   :  { %727 = vmatprep.subr.bf16.mxu0 %v1469_v6  ;;  %683 = vmatpush1.bf16.msra.mxu1 %v1525_v22  ;;  %v1493_v33 = vld [vmem:[#allocation2 + $0x1b4] ss:$8 sps:$4 sm:$0xff]   ;;  %v1543_v34 = vld [vmem:[#allocation2 + $0x40] ss:$8 sps:$4 sm:$0xff]   ;;  %v1495_v36 = vld [vmem:[#allocation2 + $0x1b0] ss:$8 sps:$4 sm:$0xff]  }
  0x33   :  { %684 = vmatprep.subr.bf16.mxu1 %v1526_v23  ;;  %v1544_v35 = vld [vmem:[#allocation2 + $0x54] ss:$8 sps:$4 sm:$0xff]   ;;  %v1496_v37 = vld [vmem:[#allocation2 + $0x1c4] ss:$8 sps:$4 sm:$0xff]   ;;  %v1549_v38 = vld [vmem:[#allocation2 + $0x50] ss:$8 sps:$4 sm:$0xff]  }
  0x34   :  { %v1550_v39 = vld [vmem:[#allocation2 + $0x64] ss:$8 sps:$4 sm:$0xff]   ;;  %v1498_v40 = vld [vmem:[#allocation2 + $0x1c0] ss:$8 sps:$4 sm:$0xff]   ;;  %v1499_v41 = vld [vmem:[#allocation2 + $0x1d4] ss:$8 sps:$4 sm:$0xff]  }
  0x35   :  { %728 = vmatpush1.bf16.msra.mxu0 %v1471_v7  ;;  %v1555_v42 = vld [vmem:[#allocation2 + $0x60] ss:$8 sps:$4 sm:$0xff]   ;;  %v1556_v43 = vld [vmem:[#allocation2 + $0x74] ss:$8 sps:$4 sm:$0xff]   ;;  %v1501_v44 = vld [vmem:[#allocation2 + $0x1d0] ss:$8 sps:$4 sm:$0xff]  }
  0x36   :  { %729 = vmatprep.subr.bf16.mxu0 %v1472_v8  ;;  %685 = vmatpush1.bf16.msra.mxu1 %v1531_v26  ;;  %v1502_v45 = vld [vmem:[#allocation2 + $0x1e4] ss:$8 sps:$4 sm:$0xff]   ;;  %v1561_v46 = vld [vmem:[#allocation2 + $0x70] ss:$8 sps:$4 sm:$0xff]   ;;  %v1504_v48 = vld [vmem:[#allocation2 + $0x1e0] ss:$8 sps:$4 sm:$0xff]  }
  0x37   :  { %686 = vmatprep.subr.bf16.mxu1 %v1532_v27  ;;  %v1562_v47 = vld [vmem:[#allocation2 + $0x84] ss:$8 sps:$4 sm:$0xff]   ;;  %v1505_v49 = vld [vmem:[#allocation2 + $0x1f4] ss:$8 sps:$4 sm:$0xff]   ;;  %v1567_v50 = vld [vmem:[#allocation2 + $0x80] ss:$8 sps:$4 sm:$0xff]  }
  0x38   :  { %v1507_v51 = vld [vmem:[#allocation2 + $0x1f0] ss:$8 sps:$4 sm:$0xff]   ;;  %v1568_v52 = vld [vmem:[#allocation2 + $0x94] ss:$8 sps:$4 sm:$0xff]   ;;  %v1510_v54 = vld [vmem:[#allocation2 + $0x204] ss:$8 sps:$4 sm:$0xff]  }
  0x39   :  { %730 = vmatpush1.bf16.msra.mxu0 %v1474_v9  ;;  %v64_v53 = vld [vmem:[%s1886_s0 + $0x10] sm:$0xff]  ;;  %v1574_v56 = vld [vmem:[#allocation2 + $0xa4] ss:$8 sps:$4 sm:$0xff]   ;;  %v1508_v59 = vld [vmem:[#allocation2 + $0x200] ss:$8 sps:$4 sm:$0xff]   ;;  %vm1715_vm1 = vmmov 0  }
  0x3a   :  { %731 = vmatprep.subr.bf16.mxu0 %v1475_v10  ;;  %687 = vmatpush1.bf16.msra.mxu1 %v1537_v30  ;;  %v1573_v55 = vld [vmem:[#allocation2 + $0x90] ss:$8 sps:$4 sm:$0xff]   ;;  %v71_v57 = vpack.c.bf16 %v64_v53, %v64_v53  ;;  %v67_v58 = vld [vmem:[%s1886_s0 + $0x28] sm:$0xff]  ;;  %v1513_v61 = vld [vmem:[#allocation2 + $0x214] ss:$8 sps:$4 sm:$0xff]   ;;  %vm1177_vm2 = vcmask 523264  }
  0x3b   :  { %688 = vmatprep.subr.bf16.mxu1 %v1538_v31  ;;  %v74_v60 = vpack.c.bf16 %v67_v58, %v67_v58  ;;  %v1579_v62 = vld [vmem:[#allocation2 + $0xa0] ss:$8 sps:$4 sm:$0xff]   ;;  %v1580_v63 = vld [vmem:[#allocation2 + $0xb4] ss:$8 sps:$4 sm:$0xff]   ;;  %v1511_v1 = vld [vmem:[#allocation2 + $0x210] ss:$8 sps:$4 sm:$0xff]  }
  0x3c   :  { %v63_v0 = vld [vmem:[%s1886_s0 + $0x8] sm:$0xff]  ;;  %v1585_v4 = vld [vmem:[#allocation2 + $0xb0] ss:$8 sps:$4 sm:$0xff]   ;;  %v1524_v7 = vld [vmem:[#allocation2 + $0x234] ss:$8 sps:$4 sm:$0xff]  }
  0x3d   :  { %732 = vmatpush1.bf16.msra.mxu0 %v1477_v11  ;;  %v70_v2 = vpack.c.bf16 %v63_v0, %v63_v0  ;;  %v1518_v3 = vld [vmem:[#allocation2 + $0x224] ss:$8 sps:$4 sm:$0xff]   ;;  %v1516_v6 = vld [vmem:[#allocation2 + $0x220] ss:$8 sps:$4 sm:$0xff]   ;;  %v1592_v9 = vld [vmem:[#allocation2 + $0xd4] ss:$8 sps:$4 sm:$0xff]  }
  0x3e   :  { %733 = vmatprep.subr.bf16.mxu0 %v1478_v12  ;;  %689 = vmatpush1.bf16.msra.mxu1 %v1543_v34  ;;  %v1586_v5 = vld [vmem:[#allocation2 + $0xc4] ss:$8 sps:$4 sm:$0xff]   ;;  %v1591_v8 = vld [vmem:[#allocation2 + $0xc0] ss:$8 sps:$4 sm:$0xff]   ;;  %v1522_v10 = vld [vmem:[#allocation2 + $0x230] ss:$8 sps:$4 sm:$0xff]  }
  0x3f   :  { %690 = vmatprep.subr.bf16.mxu1 %v1544_v35  ;;  %712 = vmatprep.mubr.bf16.mxu1 %v70_v2  ;;  %v1530_v11 = vld [vmem:[#allocation2 + $0x244] ss:$8 sps:$4 sm:$0xff]   ;;  %v1528_v12 = vld [vmem:[#allocation2 + $0x240] ss:$8 sps:$4 sm:$0xff]   ;;  %v1597_v13 = vld [vmem:[#allocation2 + $0xd0] ss:$8 sps:$4 sm:$0xff]  }
  0x40   :  { %v1598_v14 = vld [vmem:[#allocation2 + $0xe4] ss:$8 sps:$4 sm:$0xff]   ;;  %v1604_v17 = vld [vmem:[#allocation2 + $0xf4] ss:$8 sps:$4 sm:$0xff]   ;;  %v1606_v20 = vld [vmem:[#allocation2 + $0xf0] ss:$8 sps:$4 sm:$0xff]  }
  0x41   :  { %734 = vmatpush1.bf16.msra.mxu0 %v1480_v15  ;;  %v1536_v15 = vld [vmem:[#allocation2 + $0x254] ss:$8 sps:$4 sm:$0xff]   ;;  %v62_v21 = vld [vmem:[%s1886_s0] sm:$0xff]  ;;  %v1613_v35 = vld [vmem:[#allocation5 + $0x58] sm:$0xff]  }
  0x42   :  { %735 = vmatprep.subr.bf16.mxu0 %v1481_v16  ;;  %691 = vmatpush1.bf16.msra.mxu1 %v1549_v38  ;;  %v1603_v16 = vld [vmem:[#allocation2 + $0xe0] ss:$8 sps:$4 sm:$0xff]   ;;  %v1607_v22 = vld [vmem:[#allocation5 + $0x40] sm:$0xff]   ;;  %v69_v26 = vpack.c.bf16 %v62_v21, %v62_v21  ;;  %v1609_v27 = vld [vmem:[#allocation5 + $0x48] sm:$0xff]  }
  0x43   :  { %692 = vmatprep.subr.bf16.mxu1 %v1550_v39  ;;  %v1540_v23 = vld [vmem:[#allocation2 + $0x260] ss:$8 sps:$4 sm:$0xff]   ;;  %v1610_v30 = vld [vmem:[#allocation5 + $0x8] sm:$0xff]   ;;  %v1615_v39 = vld [vmem:[#allocation5 + $0x60] sm:$0xff]  }
  0x44   :  { %v1611_v31 = vld [vmem:[#allocation5 + $0x50] sm:$0xff]   ;;  %v1614_v38 = vld [vmem:[#allocation5 + $0x18] sm:$0xff]  }
  0x45   :  { %736 = vmatpush1.bf16.msra.mxu0 %v1483_v18  ;;  %v1534_v18 = vld [vmem:[#allocation2 + $0x250] ss:$8 sps:$4 sm:$0xff]   ;;  %v1612_v34 = vld [vmem:[#allocation5 + $0x10] sm:$0xff]   ;;  %v1622_v0 = vld [vmem:[#allocation5 + $0x38] sm:$0xff]  }
  0x46   :  { %737 = vmatprep.subr.bf16.mxu0 %v1484_v19  ;;  %693 = vmatpush1.bf16.msra.mxu1 %v1555_v42  ;;  %v1542_v19 = vld [vmem:[#allocation2 + $0x264] ss:$8 sps:$4 sm:$0xff]   ;;  %v1616_v42 = vld [vmem:[#allocation5 + $0x20] sm:$0xff]  }
  0x47   :  { %694 = vmatprep.subr.bf16.mxu1 %v1556_v43  ;;  %v1570_v43 = vld [vmem:[#allocation2 + $0x2b0] ss:$8 sps:$4 sm:$0xff]   ;;  %v1602_v53 = vld [vmem:[#allocation2 + $0x304] ss:$8 sps:$4 sm:$0xff]  }
  0x49   :  { %738 = vmatpush1.bf16.msra.mxu0 %v1486_v24  ;;  %v1548_v24 = vld [vmem:[#allocation2 + $0x274] ss:$8 sps:$4 sm:$0xff]  }
  0x4a   :  { %739 = vmatprep.subr.bf16.mxu0 %v1487_v25  ;;  %695 = vmatpush1.bf16.msra.mxu1 %v1561_v46  ;;  %v1608_v25 = vld [vmem:[#allocation5] sm:$0xff]  }
  0x4b   :  { %696 = vmatprep.subr.bf16.mxu1 %v1562_v47  ;;  %v1584_v46 = vld [vmem:[#allocation2 + $0x2d4] ss:$8 sps:$4 sm:$0xff]   ;;  %v1582_v47 = vld [vmem:[#allocation2 + $0x2d0] ss:$8 sps:$4 sm:$0xff]  }
  0x4d   :  { %740 = vmatpush1.bf16.msra.mxu0 %v1489_v28  ;;  %v1546_v28 = vld [vmem:[#allocation2 + $0x270] ss:$8 sps:$4 sm:$0xff]  }
  0x4e   :  { %741 = vmatprep.subr.bf16.mxu0 %v1490_v29  ;;  %697 = vmatpush1.bf16.msra.mxu1 %v1567_v50  ;;  %v1554_v29 = vld [vmem:[#allocation2 + $0x284] ss:$8 sps:$4 sm:$0xff]   ;;  %v1596_v50 = vld [vmem:[#allocation2 + $0x2f4] ss:$8 sps:$4 sm:$0xff]  }
  0x4f   :  { %698 = vmatprep.subr.bf16.mxu1 %v1568_v52  ;;  %v66_v52 = vld [vmem:[%s1886_s0 + $0x20] sm:$0xff] }
  0x51   :  { %742 = vmatpush1.bf16.msra.mxu0 %v1492_v32  ;;  %v1552_v32 = vld [vmem:[#allocation2 + $0x280] ss:$8 sps:$4 sm:$0xff]  }
  0x52   :  { %743 = vmatprep.subr.bf16.mxu0 %v1493_v33  ;;  %699 = vmatpush1.bf16.msra.mxu1 %v1573_v55  ;;  %v1560_v33 = vld [vmem:[#allocation2 + $0x294] ss:$8 sps:$4 sm:$0xff]   ;;  %v1600_v55 = vld [vmem:[#allocation2 + $0x300] ss:$8 sps:$4 sm:$0xff]  }
  0x53   :  { %700 = vmatprep.subr.bf16.mxu1 %v1574_v56  ;;  %v1713_v56 = vmov 0  }
  0x55   :  { %744 = vmatpush1.bf16.msra.mxu0 %v1495_v36  ;;  %v1558_v36 = vld [vmem:[#allocation2 + $0x290] ss:$8 sps:$4 sm:$0xff]  }
  0x56   :  { %745 = vmatprep.subr.bf16.mxu0 %v1496_v37  ;;  %701 = vmatpush1.bf16.msra.mxu1 %v1579_v62  ;;  %v1566_v37 = vld [vmem:[#allocation2 + $0x2a4] ss:$8 sps:$4 sm:$0xff]  }
  0x57   :  { %702 = vmatprep.subr.bf16.mxu1 %v1580_v63  ;;  %v1620_v62 = vld [vmem:[#allocation5 + $0x30] sm:$0xff]   ;;  %v1621_v63 = vld [vmem:[#allocation5 + $0x78] sm:$0xff]  }
  0x59   :  { %746 = vmatpush1.bf16.msra.mxu0 %v1498_v40  ;;  %v1564_v40 = vld [vmem:[#allocation2 + $0x2a0] ss:$8 sps:$4 sm:$0xff]  }
  0x5a   :  { %747 = vmatprep.subr.bf16.mxu0 %v1499_v41  ;;  %703 = vmatpush1.bf16.msra.mxu1 %v1585_v4  ;;  %v1572_v41 = vld [vmem:[#allocation2 + $0x2b4] ss:$8 sps:$4 sm:$0xff]  }
  0x5b   :  { %704 = vmatprep.subr.bf16.mxu1 %v1586_v5 }
  0x5d   :  { %748 = vmatpush1.bf16.msra.mxu0 %v1501_v44  ;;  %v1578_v44 = vld [vmem:[#allocation2 + $0x2c4] ss:$8 sps:$4 sm:$0xff]  }
  0x5e   :  { %749 = vmatprep.subr.bf16.mxu0 %v1502_v45  ;;  %705 = vmatpush1.bf16.msra.mxu1 %v1591_v8  ;;  %v1576_v45 = vld [vmem:[#allocation2 + $0x2c0] ss:$8 sps:$4 sm:$0xff]  }
  0x5f   :  { %706 = vmatprep.subr.bf16.mxu1 %v1592_v9  ;;  %v174_v9 = vld [vmem:[%s1888_s2] sm:$0x3] }
  0x61   :  { %750 = vmatpush1.bf16.msra.mxu0 %v1504_v48  ;;  %v1590_v48 = vld [vmem:[#allocation2 + $0x2e4] ss:$8 sps:$4 sm:$0xff]  }
  0x62   :  { %751 = vmatprep.subr.bf16.mxu0 %v1505_v49  ;;  %707 = vmatpush1.bf16.msra.mxu1 %v1597_v13  ;;  %v1588_v49 = vld [vmem:[#allocation2 + $0x2e0] ss:$8 sps:$4 sm:$0xff]  }
  0x63   :  { %708 = vmatprep.subr.bf16.mxu1 %v1598_v14 }
  0x65   :  { %752 = vmatpush1.bf16.msra.mxu0 %v1507_v51  ;;  %v1594_v51 = vld [vmem:[#allocation2 + $0x2f0] ss:$8 sps:$4 sm:$0xff]  }
  0x66   :  { %762 = vmatprep.subr.bf16.mxu0 %v1510_v54  ;;  %709 = vmatpush1.bf16.msra.mxu1 %v1603_v16  ;;  %v73_v54 = vpack.c.bf16 %v66_v52, %v66_v52 }
  0x67   :  { %710 = vmatprep.subr.bf16.mxu1 %v1604_v17 }
  0x68   :  { %754 = vmatmul.mubr.bf16.vlgmr.msra.gmra.mrb[0].mxu0 %v71_v57  ;;  %v68_v57 = vld [vmem:[%s1886_s0 + $0x30] sm:$0xff] }
  0x69   :  { %763 = vmatpush1.bf16.msra.mxu0 %v1508_v59  ;;  %794 = vmatprep.mubr.bf16.mxu0 %v74_v60  ;;  %v75_v58 = vpack.c.bf16 %v68_v57, %v68_v57  ;;  %v1617_v59 = vld [vmem:[#allocation5 + $0x68] sm:$0xff]  }
  0x6a   :  { %764 = vmatprep.subr.bf16.mxu0 %v1513_v61  ;;  %711 = vmatpush1.bf16.msra.mxu1 %v1606_v20  ;;  %v1618_v60 = vld [vmem:[#allocation5 + $0x28] sm:$0xff]   ;;  %v1619_v61 = vld [vmem:[#allocation5 + $0x70] sm:$0xff]  }
  0x6b   :  { %1370 = vmatprep.subr.bf16.mxu1 %v1607_v22 }
  0x6d   :  { %765 = vmatpush1.bf16.msra.mxu0 %v1511_v1  ;;  %713 = vmatmul.mubr.bf16.vlgmr.msra.gmra.mrb[0].mxu1 %v69_v26  ;;  %v1714_v1 = vmov 0.0   ;;  %v1624_v26 = vld [vmem:[%s1891_s5 + $0x8] sm:$0xff]  }
  0x6e   :  { %766 = vmatprep.subr.bf16.mxu0 %v1518_v3  ;;  %1371 = vmatpush3.bf16.msra.mxu1 %v1608_v25 }
  0x6f   :  { %1372 = vmatprep.subr.bf16.mxu1 %v1609_v27  ;;  %v1625_v27 = vld [vmem:[%s1891_s5 + $0x10] sm:$0xff]  }
  0x71   :  { %767 = vmatpush1.bf16.msra.mxu0 %v1516_v6  ;;  %v176_v6 = vlaneseq }
  0x72   :  { %768 = vmatprep.subr.bf16.mxu0 %v1524_v7  ;;  %1373 = vmatpush3.bf16.msra.mxu1 %v1610_v30  ;;  %v1628_v30 = vld [vmem:[%s1891_s5 + $0x28] sm:$0xff]  }
  0x73   :  { %1374 = vmatprep.subr.bf16.mxu1 %v1611_v31  ;;  %v177_v7 = vshrl.u32 %v176_v6, 7  ;;  %v1629_v31 = vld [vmem:[%s1891_s5 + $0x30] sm:$0xff]  }
  0x75   :  { %769 = vmatpush1.bf16.msra.mxu0 %v1522_v10  ;;  %v178_v8 = vsub.s32 0, %v177_v7  ;;  %v182_v10 = vsub.s32 1, %v177_v7 }
  0x76   :  { %770 = vmatprep.subr.bf16.mxu0 %v1530_v11  ;;  %1375 = vmatpush3.bf16.msra.mxu1 %v1612_v34  ;;  %v1338_v34 = vld [vmem:[%s1890_s4] ss:$0 sm:$0xff] }
  0x77   :  { %1376 = vmatprep.subr.bf16.mxu1 %v1613_v35  ;;  %v179_v11 = vrot.slane %v174_v9, %v178_v8 }
  0x79   :  { %771 = vmatpush1.bf16.msra.mxu0 %v1528_v12  ;;  %v183_v12 = vrot.slane %v174_v9, %v182_v10 }
  0x7a   :  { %772 = vmatprep.subr.bf16.mxu0 %v1536_v15  ;;  %1377 = vmatpush3.bf16.msra.mxu1 %v1614_v38 }
  0x7b   :  { %1378 = vmatprep.subr.bf16.mxu1 %v1615_v39 }
  0x7d   :  { %773 = vmatpush1.bf16.msra.mxu0 %v1534_v18 }
  0x7e   :  { %774 = vmatprep.subr.bf16.mxu0 %v1542_v19  ;;  %1379 = vmatpush3.bf16.msra.mxu1 %v1616_v42 }
  0x7f   :  { %1380 = vmatprep.subr.bf16.mxu1 %v1617_v59 }
  0x81   :  { %775 = vmatpush1.bf16.msra.mxu0 %v1540_v23 }
  0x82   :  { %776 = vmatprep.subr.bf16.mxu0 %v1548_v24  ;;  %1381 = vmatpush3.bf16.msra.mxu1 %v1618_v60  ;;  %v1623_v24 = vld [vmem:[%s1891_s5] sm:$0xff]  }
  0x83   :  { %1382 = vmatprep.subr.bf16.mxu1 %v1619_v61 }
  0x85   :  { %777 = vmatpush1.bf16.msra.mxu0 %v1546_v28  ;;  %v1626_v28 = vld [vmem:[%s1891_s5 + $0x18] sm:$0xff]  }
  0x86   :  { %778 = vmatprep.subr.bf16.mxu0 %v1554_v29  ;;  %1383 = vmatpush3.bf16.msra.mxu1 %v1620_v62  ;;  %v1627_v29 = vld [vmem:[%s1891_s5 + $0x20] sm:$0xff]  }
  0x87   :  { %1384 = vmatprep.subr.bf16.mxu1 %v1621_v63 }
  0x89   :  { %779 = vmatpush1.bf16.msra.mxu0 %v1552_v32  ;;  %v1630_v32 = vld [vmem:[%s1891_s5 + $0x38] sm:$0xff]  }
  0x8a   :  { %780 = vmatprep.subr.bf16.mxu0 %v1560_v33  ;;  %1385 = vmatpush3.bf16.msra.mxu1 %v1622_v0 }
  0x8b   :  { %1406 = vmatprep.subr.bf16.mxu1 %v1714_v1 }
  0x8d   :  { %781 = vmatpush1.bf16.msra.mxu0 %v1558_v36 }
  0x8e   :  { %782 = vmatprep.subr.bf16.mxu0 %v1566_v37 }
  0x91   :  { %783 = vmatpush1.bf16.msra.mxu0 %v1564_v40 }
  0x92   :  { %784 = vmatprep.subr.bf16.mxu0 %v1572_v41  ;;  %v1631_v41 = vld [vmem:[%s1893_s7] sm:$0xff]  }
  0x95   :  { %785 = vmatpush1.bf16.msra.mxu0 %v1570_v43  ;;  %v1632_v43 = vld [vmem:[%s1893_s7 + $0x8] sm:$0xff]  }
  0x96   :  { %786 = vmatprep.subr.bf16.mxu0 %v1578_v44  ;;  %v1633_v44 = vld [vmem:[%s1893_s7 + $0x10] sm:$0xff]  }
  0x99   :  { %787 = vmatpush1.bf16.msra.mxu0 %v1576_v45  ;;  %v1634_v45 = vld [vmem:[%s1893_s7 + $0x18] sm:$0xff]   ;;  %s1716_s7 = smov [#allocation7]  }
  0x9a   :  { %788 = vmatprep.subr.bf16.mxu0 %v1584_v46  ;;  %v1355_v46 = vld [vmem:[%s1892_s6] ss:$0 sm:$0xff]  ;;  %s1229_s11 = sshll.u32 %s1716_s7, 4  ;;  %s1230_s11 = int_to_ptr.vmem [resolvable:$true] %s1229_s11 }
  0x9b   :  { %s1679_s6 = scalar_lea.vmem %s1230_s11, 64  ;;  %p1684_p3 = scmp.lt.s32.totalorder %s1230_s11, %s1230_s11 }
  0x9c   :  { %p1680_p2 = scmp.ne.s32.totalorder %s1230_s11, %s1679_s6  ;;  %p1685_p4 = scmp.lt.s32.totalorder %s1679_s6, %s1679_s6 }
  0x9d   :  { %789 = vmatpush1.bf16.msra.mxu0 %v1582_v47 }
  0x9e   :  { %790 = vmatprep.subr.bf16.mxu0 %v1590_v48  ;;  %p1686_p5 = por %p1685_p4, %p1684_p3 }
  0xa0   :  { %p1687_p6 = pnand %p1686_p5, %p1680_p2 }
  0xa1   :  { %791 = vmatpush1.bf16.msra.mxu0 %v1588_v49 }
  0xa2   :  { %792 = vmatprep.subr.bf16.mxu0 %v1596_v50 }
  0xa5   :  { %793 = vmatpush1.bf16.msra.mxu0 %v1594_v51 }
  0xa6   :  { %803 = vmatprep.subr.bf16.mxu0 %v1602_v53 }
  0xa8   :  { %795 = vmatmul.mubr.bf16.vlgmr.msra.gmra.mrb[0].mxu0 %v73_v54  ;;  %v1364_v54 = vld [vmem:[%s1894_s8] ss:$0 sm:$0xff] }
  0xa9   :  { %804 = vmatpush1.bf16.msra.mxu0 %v1600_v55  ;;  %835 = vmatprep.mubr.bf16.mxu0 %v1713_v56 }
  0xb4   :  { %1337 = vmatmul.mubr.msk.bf16.vlgmr.msra.gmra.mrb[0].mxu0 %vm676_vm0, %v75_v58 }
 0x140   :  { %v714_v2 = vpop.f32.mrb[0].mxu1 }
 0x141   :  { %v716_v3 = vpop.f32.mrb[1].mxu1  ;;  %v715_v13 = vadd.f32 %v714_v2, %v179_v11 }
 0x142   :  { %v718_v4 = vpop.f32.mrb[2].mxu1  ;;  %v717_v14 = vadd.f32 %v716_v3, %v183_v12 }
 0x143   :  { %v719_v5 = vpop.f32.mrb[3].mxu1 }
 0x187   :  { %v837_v15 = vpop.f32.mrb[0].mxu0 }
 0x188   :  { %v1439_v16 = vadd.f32 %v837_v15, %v715_v13  ;;  %v839_v17 = vpop.f32.mrb[1].mxu0 }
 0x189   :  { %v1441_v18 = vadd.f32 %v839_v17, %v717_v14  ;;  %v841_v19 = vpop.f32.mrb[2].mxu0 }
 0x18a   :  { %v844_v20 = vmax.f32 %v1439_v16, 0.0  ;;  %v842_v21 = vpop.f32.mrb[3].mxu0 }
 0x18b   :  { %v845_v22 = vmax.f32 %v1441_v18, 0.0 }
 0x18c   :  { %v846_v25 = vpack.c.bf16 %v844_v20, %v844_v20 }
 0x18d   :  { %v847_v23 = vpack.c.bf16 %v845_v22, %v845_v22 }
 0x18f   :  { %1015 = vmatprep.mubr.bf16.mxu1 %v847_v23 }
 0x190   :  { %1016 = vmatmul.mubr.bf16.vlgmr.msra.gmra.mrb[4].mxu1 %v846_v25 }
 0x191   :  { %1407 = vmatpush3.bf16.msra.mxu1 %v1623_v24  ;;  %1422 = vmatprep.mubr.msk.bf16.mxu1 %vm1715_vm1, %v1714_v1 }
 0x192   :  { %1408 = vmatprep.subr.bf16.mxu1 %v1714_v1 }
 0x195   :  { %1409 = vmatpush3.bf16.msra.mxu1 %v1624_v26 }
 0x196   :  { %1410 = vmatprep.subr.bf16.mxu1 %v1714_v1 }
 0x199   :  { %1411 = vmatpush3.bf16.msra.mxu1 %v1625_v27 }
 0x19a   :  { %1412 = vmatprep.subr.bf16.mxu1 %v1714_v1 }
 0x19d   :  { %1413 = vmatpush3.bf16.msra.mxu1 %v1626_v28 }
 0x19e   :  { %1414 = vmatprep.subr.bf16.mxu1 %v1714_v1 }
 0x1a1   :  { %1415 = vmatpush3.bf16.msra.mxu1 %v1627_v29 }
 0x1a2   :  { %1416 = vmatprep.subr.bf16.mxu1 %v1714_v1 }
 0x1a5   :  { %1417 = vmatpush3.bf16.msra.mxu1 %v1628_v30 }
 0x1a6   :  { %1418 = vmatprep.subr.bf16.mxu1 %v1714_v1 }
 0x1a9   :  { %1419 = vmatpush3.bf16.msra.mxu1 %v1629_v31 }
 0x1aa   :  { %1420 = vmatprep.subr.bf16.mxu1 %v1714_v1 }
 0x1ad   :  { %1421 = vmatpush3.bf16.msra.mxu1 %v1630_v32 }
 0x1ae   :  { %1426 = vmatprep.subr.bf16.mxu1 %v1714_v1 }
 0x263   :  { %v1386_v33 = vpop.f32.mrb[4].mxu1 }
 0x264   :  { %v1387_v35 = vpop.f32.mrb[5].mxu1 }
 0x265   :  { %v1388_v36 = vadd.f32 %v1387_v35, %v1386_v33  ;;  %v1389_v37 = vpop.f32.mrb[6].mxu1 }
 0x266   :  { %v1390_v38 = vpop.f32.mrb[7].mxu1 }
 0x267   :  { %v1018_v39 = vadd.f32 %v1388_v36, %v1338_v34 }
 0x269   :  { %v1023_v40 = vmax.f32 %v1018_v39, 0.0 }
 0x26b   :  { %v1024_v42 = vpack.c.bf16 %v1023_v40, %v1023_v40 }
 0x26d   :  { %1423 = vmatmul.mubr.bf16.vlgmr.msra.gmra.mrb[8].mxu1 %v1024_v42 }
 0x26e   :  { %1427 = vmatpush3.bf16.msra.mxu1 %v1631_v41  ;;  %1434 = vmatprep.mubr.msk.bf16.mxu1 %vm1715_vm1, %v1714_v1 }
 0x26f   :  { %1428 = vmatprep.subr.bf16.mxu1 %v1714_v1 }
 0x272   :  { %1429 = vmatpush3.bf16.msra.mxu1 %v1632_v43 }
 0x273   :  { %1430 = vmatprep.subr.bf16.mxu1 %v1714_v1 }
 0x276   :  { %1431 = vmatpush3.bf16.msra.mxu1 %v1633_v44 }
 0x277   :  { %1432 = vmatprep.subr.bf16.mxu1 %v1714_v1 }
 0x27a   :  { %1433 = vmatpush3.bf16.msra.mxu1 %v1634_v45 }
 0x340   :  { %v1130_v47 = vpop.f32.mrb[8].mxu1 }
 0x341   :  { %v1131_v48 = vadd.f32 %v1355_v46, %v1130_v47  ;;  %v1424_v49 = vpop.f32.mrb[9].mxu1 }
 0x342   :  { %v1133_v50 = vpop.f32.mrb[10].mxu1 }
 0x343   :  { %v1136_v51 = vmax.f32 %v1131_v48, 0.0  ;;  %v1425_v52 = vpop.f32.mrb[11].mxu1 }
 0x345   :  { %v1137_v53 = vpack.c.bf16 %v1136_v51, %v1136_v51 }
 0x347   :  { %1435 = vmatmul.mubr.msk.bf16.vlgmr.msra.gmra.mrb[12].mxu1 %vm1177_vm2, %v1137_v53 }
 0x41a   :  { %v1215_v55 = vpop.f32.mrb[12].mxu1 }
 0x41b   :  { %v1216_v56 = vadd.f32 %v1364_v54, %v1215_v55  ;;  %v1436_v57 = vpop.f32.mrb[13].mxu1 }
 0x41c   :  { %v1218_v58 = vpop.f32.mrb[14].mxu1 }
 0x41d   :  { %v1221_v59 = vpack.c.bf16 %v1216_v56, %v1216_v56  ;;  %v1437_v60 = vpop.f32.mrb[15].mxu1 }
 0x41f   :  { %1222 = vst [vmem:[#allocation7] sm:$0xf] %v1221_v59 }
 0x420   :  { %1690 = shalt.err (!%p1687_p6)
}
 0x421   :  { %s1691_s8 = scalar_lea.hbm %s1895_s9, 64 }
 0x422   :  { %p1692_p7 = scmp.ne.s32.totalorder %s1895_s9, %s1691_s8  ;;  %p1695_p8 = scmp.lt.u32.totalorder %s1691_s8, %s1895_s9 }
 0x424   :  { %p1697_p9 = pnand %p1695_p8, %p1692_p7 }
 0x426   :  { %1700 = shalt.err (!%p1697_p9)
}
 0x427   :  { %1232 = dma.vmem_to_hbm [thread:$0]  %s1230_s11, 64, %s1895_s9, [#allocation4]  }
 0x428   :  { %1705 = dma.done.wait [#allocation4], 64  }
 0x429   :  { %1706 = vsyncadd [#allocation4], 4294967232 }
 0x42a   :  { %1236 = vsyncpa [#allocation3], 1 }
 0x42b   :  { %1237 = vsyncpa [#allocation6], 1 }
 0x42c   :  { %1238 = vsyncpa [#allocation4], 1 }

</bundles_post_ra>
